<compile_context>
chip_gen: v6e
topology: v6e:2x2x1
jax: 0.10.0
libtpu: 0.0.40
codegen_flags: <defaults>
</compile_context>

<pallas_src>
import math

import jax
import jax.numpy as jnp
from jax.experimental import pallas as pl
from jax.experimental.pallas import tpu as pltpu


def _round_up(x: int, n: int) -> int:
    return ((x + n - 1) // n) * n


def _mlp_kernel(x_ref, w1_ref, b1_ref, w2_ref, b2_ref, o_ref):
    # x_ref : (tm, C_in)   f32 (cast to bf16 in-kernel)
    # w1_ref: (C_in, C1)   bf16      b1_ref: (1, C1)  f32
    # w2_ref: (C1, C2)     bf16      b2_ref: (1, C2)  f32
    # o_ref : (tm, C2)     f32
    x = x_ref[...].astype(w1_ref.dtype)                       # VPU cast, hidden under MXU/DMA
    h = jnp.dot(x, w1_ref[...], preferred_element_type=jnp.float32)
    h = jnp.maximum(h + b1_ref[...], 0.0)                     # bias + ReLU in f32 on the VPU
    y = jnp.dot(h.astype(w2_ref.dtype), w2_ref[...],
                preferred_element_type=jnp.float32) + b2_ref[...]
    o_ref[...] = y.astype(o_ref.dtype)


def layer_forward(x, w1, b1, w2, b2, *, tm=256, compute_dtype=jnp.bfloat16):
    """x: (..., C_in). w1: (C1, C_in), b1: (C1,), w2: (C2, C1_req), b2: (C2,).

    Returns relu(x @ w1.T + b1) @ w2.T + b2 with shape (..., C2), dtype f32.
    """
    orig_shape = x.shape
    c_in = orig_shape[-1]
    c1, k_in = w1.shape                      # PyTorch convention: (out, in)
    assert k_in == c_in, "l1 in_features must match x's last dim"
    c2, c1_req = w2.shape
    assert c1_req == c1, "module requires l1 out_features == l2 in_features"

    m = math.prod(orig_shape[:-1]) if len(orig_shape) > 1 else 1
    x2 = x.reshape(m, c_in)

    # Row tile: multiple of 8 sublanes, no larger than the (8-rounded) row count.
    tm_eff = _round_up(min(tm, _round_up(m, 8)), 8)
    m_p = _round_up(m, tm_eff)
    if m_p != m:
        # Only materialize a padding copy when the row count is ragged.
        x2 = jnp.pad(x2, ((0, m_p - m), (0, 0)))

    cd = jnp.dtype(compute_dtype)
    out_dtype = jnp.float32

    # Pre-transpose weights to (in, out) and cast once; biases as (1, out) f32.
    w1_t = w1.T.astype(cd)                               # (c_in, c1)
    w2_t = w2.T.astype(cd)                               # (c1,   c2)
    b1_r = b1.reshape(1, c1).astype(jnp.float32)
    b2_r = b2.reshape(1, c2).astype(jnp.float32)

    grid = (m_p // tm_eff,)

    x_bytes = jnp.dtype(x2.dtype).itemsize

    # Advisory cost estimate (bias/ReLU flops negligible next to the matmuls).
    flops = 2 * m_p * c_in * c1 + 2 * m_p * c1 * c2
    bytes_accessed = (
        m_p * c_in * x_bytes                                   # x in
        + (c_in * c1 + c1 * c2) * cd.itemsize                  # weights
        + (c1 + c2) * 4                                        # biases
        + m_p * c2 * jnp.dtype(out_dtype).itemsize             # out
    )

    # VMEM budget: double-buffered x/out tiles + (conservatively double-
    # buffered) resident weights + biases, with ~50% headroom.
    vmem_needed = (
        2 * tm_eff * c_in * x_bytes
        + 2 * tm_eff * c2 * jnp.dtype(out_dtype).itemsize
        + 2 * (c_in * c1 + c1 * c2) * cd.itemsize
        + 2 * (c1 + c2) * 4
    )
    vmem_limit = min(64 * 1024 * 1024,
                     max(32 * 1024 * 1024, int(vmem_needed * 1.5)))

    out = pl.pallas_call(
        _mlp_kernel,
        out_shape=jax.ShapeDtypeStruct((m_p, c2), out_dtype),
        grid_spec=pltpu.PrefetchScalarGridSpec(
            num_scalar_prefetch=0,
            grid=grid,
            in_specs=[
                pl.BlockSpec((tm_eff, c_in), lambda i: (i, 0)),   # x row tile
                pl.BlockSpec((c_in, c1), lambda i: (0, 0)),       # W1^T (resident)
                pl.BlockSpec((1, c1), lambda i: (0, 0)),          # b1
                pl.BlockSpec((c1, c2), lambda i: (0, 0)),         # W2^T (resident)
                pl.BlockSpec((1, c2), lambda i: (0, 0)),          # b2
            ],
            out_specs=pl.BlockSpec((tm_eff, c2), lambda i: (i, 0)),
        ),
        compiler_params=pltpu.CompilerParams(
            dimension_semantics=("parallel",),
            vmem_limit_bytes=vmem_limit,
        ),
        cost_estimate=pl.CostEstimate(
            flops=flops, transcendentals=0, bytes_accessed=bytes_accessed),
    )(x2, w1_t, b1_r, w2_t, b2_r)

    if m_p != m:
        out = out[:m]
    return out.reshape(orig_shape[:-1] + (c2,))


def _init_linear(key, in_features, out_features):
    # Deterministic init mimicking nn.Linear's default (uniform +/- 1/sqrt(in)).
    kw, kb = jax.random.split(key)
    bound = 1.0 / (in_features ** 0.5)
    w = jax.random.uniform(kw, (out_features, in_features),
                           minval=-bound, maxval=bound, dtype=jnp.float32)
    b = jax.random.uniform(kb, (out_features,),
                           minval=-bound, maxval=bound, dtype=jnp.float32)
    return w, b


def _reference(x, w1, b1, w2, b2):
    return jnp.maximum(x @ w1.T + b1, 0.0) @ w2.T + b2


if __name__ == "__main__":
    key = jax.random.PRNGKey(0)

    # --- Test 1: small, lane-ragged channels (batch=2, seq=8, hidden=32) ---
    k_x, k_l1, k_l2, key = jax.random.split(key, 4)
    batch, seq, hidden = 2, 8, 32
    x = jax.random.normal(k_x, (batch, seq, hidden), dtype=jnp.float32)
    w1, b1 = _init_linear(k_l1, hidden, hidden)
    w2, b2 = _init_linear(k_l2, hidden, hidden)

    y = jax.block_until_ready(layer_forward(x, w1, b1, w2, b2))
    ref = _reference(x, w1, b1, w2, b2)
    assert y.shape == (batch, seq, hidden)
    assert jnp.allclose(y, ref, atol=2e-2, rtol=2e-2), float(jnp.abs(y - ref).max())

    # --- Test 2: lane-aligned channels (batch=4, seq=16, hidden=128) ---
    k_x, k_l1, k_l2, key = jax.random.split(key, 4)
    batch, seq, hidden = 4, 16, 128
    x = jax.random.normal(k_x, (batch, seq, hidden), dtype=jnp.float32)
    w1, b1 = _init_linear(k_l1, hidden, hidden)
    w2, b2 = _init_linear(k_l2, hidden, hidden)

    y = jax.block_until_ready(layer_forward(x, w1, b1, w2, b2))
    ref = _reference(x, w1, b1, w2, b2)
    assert y.shape == (batch, seq, hidden)
    assert jnp.allclose(y, ref, atol=2e-2, rtol=2e-2), float(jnp.abs(y - ref).max())

    print("KERNEL_OK")
</pallas_src>

<mosaic_0001>
module attributes {stable_mosaic.version = 11 : i64} {
  func.func @_mlp_kernel(%arg0: i32, %arg1: memref<16x32xf32, #tpu.memory_space<vmem>>, %arg2: memref<32x32xbf16, #tpu.memory_space<vmem>>, %arg3: memref<1x32xf32, #tpu.memory_space<vmem>>, %arg4: memref<32x32xbf16, #tpu.memory_space<vmem>>, %arg5: memref<1x32xf32, #tpu.memory_space<vmem>>, %arg6: memref<16x32xf32, #tpu.memory_space<vmem>>) attributes {dimension_semantics = [#tpu.dimension_semantics<parallel>], iteration_bounds = array<i64: 1>, scalar_prefetch = 0 : i64, scratch_operands = 0 : i64, tpu.core_type = #tpu.core_type<tc>, window_params = [{transform_indices = @transform_0, window_bounds = array<i64: 16, 32>}, {pipeline_mode = #tpu.pipeline_mode<synchronous>, transform_indices = @transform_1, window_bounds = array<i64: 32, 32>}, {pipeline_mode = #tpu.pipeline_mode<synchronous>, transform_indices = @transform_2, window_bounds = array<i64: 1, 32>}, {pipeline_mode = #tpu.pipeline_mode<synchronous>, transform_indices = @transform_3, window_bounds = array<i64: 32, 32>}, {pipeline_mode = #tpu.pipeline_mode<synchronous>, transform_indices = @transform_4, window_bounds = array<i64: 1, 32>}, {transform_indices = @transform_5, window_bounds = array<i64: 16, 32>}]} {
    %c0 = arith.constant 0 : index
    %c0_0 = arith.constant 0 : index
    %0 = vector.load %arg1[%c0, %c0_0] : memref<16x32xf32, #tpu.memory_space<vmem>>, vector<16x32xf32>
    %1 = arith.truncf %0 : vector<16x32xf32> to vector<16x32xbf16>
    %c0_1 = arith.constant 0 : index
    %c0_2 = arith.constant 0 : index
    %2 = vector.load %arg2[%c0_1, %c0_2] : memref<32x32xbf16, #tpu.memory_space<vmem>>, vector<32x32xbf16>
    %cst = arith.constant dense<0.000000e+00> : vector<16x32xf32>
    %3 = tpu.matmul %1, %2, %cst {dimension_numbers = #tpu.dot_dimension_numbers<[1], [0], [0], [1], [0, 0, 1, 1], [], []>} : vector<16x32xbf16>, vector<32x32xbf16>, vector<16x32xf32> -> vector<16x32xf32>
    %c0_3 = arith.constant 0 : index
    %c0_4 = arith.constant 0 : index
    %4 = vector.load %arg3[%c0_3, %c0_4] : memref<1x32xf32, #tpu.memory_space<vmem>>, vector<1x32xf32>
    %5 = vector.broadcast %4 : vector<1x32xf32> to vector<16x32xf32>
    %6 = arith.addf %3, %5 : vector<16x32xf32>
    %cst_5 = arith.constant 0.000000e+00 : f32
    %7 = vector.broadcast %cst_5 : f32 to vector<16x32xf32>
    %8 = arith.maximumf %6, %7 : vector<16x32xf32>
    %9 = arith.truncf %8 : vector<16x32xf32> to vector<16x32xbf16>
    %c0_6 = arith.constant 0 : index
    %c0_7 = arith.constant 0 : index
    %10 = vector.load %arg4[%c0_6, %c0_7] : memref<32x32xbf16, #tpu.memory_space<vmem>>, vector<32x32xbf16>
    %cst_8 = arith.constant dense<0.000000e+00> : vector<16x32xf32>
    %11 = tpu.matmul %9, %10, %cst_8 {dimension_numbers = #tpu.dot_dimension_numbers<[1], [0], [0], [1], [0, 0, 1, 1], [], []>} : vector<16x32xbf16>, vector<32x32xbf16>, vector<16x32xf32> -> vector<16x32xf32>
    %c0_9 = arith.constant 0 : index
    %c0_10 = arith.constant 0 : index
    %12 = vector.load %arg5[%c0_9, %c0_10] : memref<1x32xf32, #tpu.memory_space<vmem>>, vector<1x32xf32>
    %13 = vector.broadcast %12 : vector<1x32xf32> to vector<16x32xf32>
    %14 = arith.addf %11, %13 : vector<16x32xf32>
    %c0_11 = arith.constant 0 : index
    %c0_12 = arith.constant 0 : index
    %15 = vector.load %arg6[%c0_11, %c0_12] : memref<16x32xf32, #tpu.memory_space<vmem>>, vector<16x32xf32>
    tpu.vector_store %arg6[%c0_11, %c0_12], %14 {strides = array<i32>} : memref<16x32xf32, #tpu.memory_space<vmem>>, vector<16x32xf32>,
    return
  }
  func.func @transform_0(%arg0: i32) -> (i32, i32) {
    %c0_i32 = arith.constant 0 : i32
    %c0_i32_0 = arith.constant 0 : i32
    return %arg0, %c0_i32 : i32, i32
  }
  func.func @transform_1(%arg0: i32) -> (i32, i32) {
    %c0_i32 = arith.constant 0 : i32
    %c0_i32_0 = arith.constant 0 : i32
    %c0_i32_1 = arith.constant 0 : i32
    return %c0_i32, %c0_i32_0 : i32, i32
  }
  func.func @transform_2(%arg0: i32) -> (i32, i32) {
    %c0_i32 = arith.constant 0 : i32
    %c0_i32_0 = arith.constant 0 : i32
    %c0_i32_1 = arith.constant 0 : i32
    return %c0_i32, %c0_i32_0 : i32, i32
  }
  func.func @transform_3(%arg0: i32) -> (i32, i32) {
    %c0_i32 = arith.constant 0 : i32
    %c0_i32_0 = arith.constant 0 : i32
    %c0_i32_1 = arith.constant 0 : i32
    return %c0_i32, %c0_i32_0 : i32, i32
  }
  func.func @transform_4(%arg0: i32) -> (i32, i32) {
    %c0_i32 = arith.constant 0 : i32
    %c0_i32_0 = arith.constant 0 : i32
    %c0_i32_1 = arith.constant 0 : i32
    return %c0_i32, %c0_i32_0 : i32, i32
  }
  func.func @transform_5(%arg0: i32) -> (i32, i32) {
    %c0_i32 = arith.constant 0 : i32
    %c0_i32_0 = arith.constant 0 : i32
    return %arg0, %c0_i32 : i32, i32
  }
}

</mosaic_0001>

<bundles_post_ra>
// kernel: tpu_custom_call.1
= control target key start
LH: loop header
LB: loop body
LE: loop exit
PB: predicated region body
PF: predicated region fallthrough
CT: control target
= control target key end

     0   :  { %10 = vsyncpa [#allocation3], 0  ;;  %s422_s0 = inlined_call_operand.hbm [shape: f32[16,32], index: 0, kind: input, shape index: {}]   ;;  %s423_s1 = inlined_call_operand.hbm [shape: bf16[32,32], index: 1, kind: input, shape index: {}]   ;;  %s424_s2 = inlined_call_operand.vmem [shape: f32[1,32], index: 2, kind: input, shape index: {}]   ;;  %s425_s3 = inlined_call_operand.hbm [shape: bf16[32,32], index: 3, kind: input, shape index: {}]   ;;  %s426_s4 = inlined_call_operand.vmem [shape: f32[1,32], index: 4, kind: input, shape index: {}]   ;;  %s427_s5 = inlined_call_operand.hbm [shape: f32[16,32], index: 5, kind: output, shape index: {}]  }
   0x1   :  { %11 = vsyncpa [#allocation6], 0 }
   0x2   :  { %12 = vsyncpa [#allocation4], 0  ;;  %s354_s18 = smov [#allocation5]  }
   0x3   :  { %s30_s19 = sshll.u32 %s354_s18, 4  ;;  %s31_s19 = int_to_ptr.vmem [resolvable:$true] %s30_s19 }
   0x4   :  { %s276_s20 = scalar_lea.vmem %s31_s19, 256  ;;  %p281_p1 = scmp.lt.s32.totalorder %s31_s19, %s31_s19 }
   0x5   :  { %p277_p0 = scmp.ne.s32.totalorder %s31_s19, %s276_s20  ;;  %p282_p2 = scmp.lt.s32.totalorder %s276_s20, %s276_s20 }
   0x7   :  { %p283_p3 = por %p282_p2, %p281_p1 }
   0x9   :  { %p284_p4 = pnand %p283_p3, %p277_p0 }
   0xb   :  { %287 = shalt.err (!%p284_p4)
}
   0xc   :  { %s355_s21 = smov 64   ;;  %s356_s22 = smov 4  }
   0xd   :  { %36 = dma.hbm_to_vmem [thread:$0]  %s423_s1, 256, %s31_s19, [#allocation6], %s355_s21, %s355_s21, %s356_s22  }
   0xe   :  { %s357_s25 = smov [#allocation2]  }
   0xf   :  { %s18_s26 = sshll.u32 %s357_s25, 4  ;;  %s19_s26 = int_to_ptr.vmem [resolvable:$true] %s18_s26 }
  0x10   :  { %s296_s27 = scalar_lea.vmem %s19_s26, 256  ;;  %p301_p6 = scmp.lt.s32.totalorder %s19_s26, %s19_s26 }
  0x11   :  { %p297_p5 = scmp.ne.s32.totalorder %s19_s26, %s296_s27  ;;  %p302_p7 = scmp.lt.s32.totalorder %s296_s27, %s296_s27 }
  0x13   :  { %p303_p8 = por %p302_p7, %p301_p6 }
  0x15   :  { %p304_p9 = pnand %p303_p8, %p297_p5 }
  0x17   :  { %307 = shalt.err (!%p304_p9)
}
  0x18   :  { %s358_s28 = smov 128   ;;  %s359_s29 = smov 8  }
  0x19   :  { %24 = dma.hbm_to_vmem [thread:$0]  %s422_s0, 256, %s19_s26, [#allocation3], %s358_s28, %s358_s28, %s359_s29  }
  0x1a   :  { %s360_s1 = smov [#allocation7]  }
  0x1b   :  { %s44_s7 = sshll.u32 %s360_s1, 4  ;;  %s45_s7 = int_to_ptr.vmem [resolvable:$true] %s44_s7 }
  0x1c   :  { %s316_s8 = scalar_lea.vmem %s45_s7, 256  ;;  %p321_p11 = scmp.lt.s32.totalorder %s45_s7, %s45_s7 }
  0x1d   :  { %p317_p10 = scmp.ne.s32.totalorder %s45_s7, %s316_s8  ;;  %p322_p12 = scmp.lt.s32.totalorder %s316_s8, %s316_s8 }
  0x1f   :  { %p323_p13 = por %p322_p12, %p321_p11 }
  0x21   :  { %p324_p0 = pnand %p323_p13, %p317_p10 }
  0x23   :  { %327 = shalt.err (!%p324_p0)
}
  0x24   :  { %50 = dma.hbm_to_vmem [thread:$0]  %s425_s3, 256, %s45_s7, [#allocation6], %s355_s21, %s355_s21, %s356_s22  }
  0x25   :  { %348 = dma.done.wait [#allocation3], 256  }
  0x26   :  { %349 = vsyncadd [#allocation3], 4294967040 }
  0x27   :  { %350 = dma.done.wait [#allocation6], 512  }
  0x28   :  { %351 = vsyncadd [#allocation6], 4294966784  ;;  %v361_v0 = vmov 0.0   ;;  %vm362_vm0 = vmmov 0   ;;  %v264_v1 = vld [vmem:[#allocation5 + $0x8] sm:$0xff]   ;;  %v265_v2 = vld [vmem:[#allocation5] sm:$0xff]  }
  0x29   :  { %238 = vmatprep.subr.bf16.mxu0 %v361_v0  ;;  %242 = vmatprep.mubr.msk.bf16.mxu0 %vm362_vm0, %v361_v0  ;;  %v63_v3 = vld [vmem:[#allocation2] sm:$0xff]  ;;  %v64_v4 = vld [vmem:[#allocation2 + $0x8] sm:$0xff]  ;;  %vm89_vm1 = vcmask 261120   ;;  %s363_s13 = smov [#allocation8]  }
  0x2a   :  { %246 = vmatprep.subr.bf16.mxu1 %v361_v0  ;;  %250 = vmatprep.mubr.msk.bf16.mxu1 %vm362_vm0, %v361_v0  ;;  %v65_v5 = vpack.c.bf16 %v64_v4, %v63_v3  ;;  %v266_v6 = vld [vmem:[#allocation7 + $0x8] sm:$0xff]   ;;  %v267_v7 = vld [vmem:[#allocation7] sm:$0xff]  }
  0x2b   :  { %239 = vmatpush3.bf16.msra.mxu0 %v264_v1  ;;  %247 = vmatpush3.bf16.msra.mxu1 %v266_v6  ;;  %v224_v8 = vld [vmem:[%s424_s2] ss:$0 sm:$0xff]  ;;  %s211_s2 = sshll.u32 %s363_s13, 4  ;;  %s212_s2 = int_to_ptr.vmem [resolvable:$true] %s211_s2 }
  0x2c   :  { %240 = vmatprep.subr.bf16.mxu0 %v361_v0  ;;  %248 = vmatprep.subr.bf16.mxu1 %v361_v0  ;;  %v228_v18 = vld [vmem:[%s426_s4] ss:$0 sm:$0xff]  ;;  %s328_s14 = scalar_lea.vmem %s212_s2, 256  ;;  %p333_p2 = scmp.lt.s32.totalorder %s212_s2, %s212_s2 }
  0x2d   :  { %p329_p1 = scmp.ne.s32.totalorder %s212_s2, %s328_s14  ;;  %p334_p3 = scmp.lt.s32.totalorder %s328_s14, %s328_s14 }
  0x2f   :  { %241 = vmatpush3.bf16.msra.mxu0 %v265_v2  ;;  %249 = vmatpush3.bf16.msra.mxu1 %v267_v7  ;;  %p335_p4 = por %p334_p3, %p333_p2 }
  0x31   :  { %p336_p5 = pnand %p335_p4, %p329_p1 }
  0x32   :  { %243 = vmatmul.mubr.msk.bf16.vlgmr.msra.gmra.mxu0 %vm89_vm1, %v65_v5 }
  0xf2   :  { %v127_v9 = vpop.f32.mrf.mxu0 }
  0xf3   :  { %v128_v11 = vadd.f32 %v224_v8, %v127_v9 }
  0xf4   :  { %v244_v10 = vpop.f32.mrf.mxu0 }
  0xf5   :  { %v134_v15 = vmax.f32 %v128_v11, 0.0 }
  0xf6   :  { %v130_v12 = vpop.f32.mrf.mxu0 }
  0xf7   :  { %v131_v13 = vadd.f32 %v224_v8, %v130_v12 }
  0xf8   :  { %v245_v14 = vpop.f32.mrf.mxu0 }
  0xf9   :  { %v135_v16 = vmax.f32 %v131_v13, 0.0 }
  0xfb   :  { %v136_v17 = vpack.c.bf16 %v135_v16, %v134_v15 }
  0xfd   :  { %251 = vmatmul.mubr.msk.bf16.vlgmr.msra.gmra.mxu1 %vm89_vm1, %v136_v17 }
 0x1bd   :  { %v197_v19 = vpop.f32.mrf.mxu1 }
 0x1be   :  { %v198_v20 = vadd.f32 %v228_v18, %v197_v19 }
 0x1bf   :  { %v252_v21 = vpop.f32.mrf.mxu1 }
 0x1c0   :  { %204 = vst.msk [vmem:[#allocation8] sm:$0xff] %vm89_vm1, %v198_v20 }
 0x1c1   :  { %v200_v22 = vpop.f32.mrf.mxu1 }
 0x1c2   :  { %v201_v23 = vadd.f32 %v228_v18, %v200_v22 }
 0x1c3   :  { %v253_v24 = vpop.f32.mrf.mxu1 }
 0x1c4   :  { %205 = vst.msk [vmem:[#allocation8 + $0x8] sm:$0xff] %vm89_vm1, %v201_v23 }
 0x1c5   :  { %339 = shalt.err (!%p336_p5)
}
 0x1c6   :  { %217 = dma.vmem_to_hbm [thread:$0]  %s212_s2, 256, %s427_s5, [#allocation4], %s358_s28, %s358_s28, %s359_s29  }
 0x1c7   :  { %352 = dma.done.wait [#allocation4], 256  }
 0x1c8   :  { %353 = vsyncadd [#allocation4], 4294967040 }
 0x1c9   :  { %221 = vsyncpa [#allocation3], 1 }
 0x1ca   :  { %222 = vsyncpa [#allocation6], 1 }
 0x1cb   :  { %223 = vsyncpa [#allocation4], 1 }

</bundles_post_ra>
